<compile_context>
chip_gen: v5e
topology: v5e:2x2
jax: 0.10.0
libtpu: 0.0.40
codegen_flags: <defaults>
</compile_context>

<pallas_src>
import functools

import jax
import jax.numpy as jnp
from jax.experimental import pallas as pl
from jax.experimental.pallas import tpu as pltpu


def _round_up(x, m):
    return ((x + m - 1) // m) * m


def _choose_group_tile(input_groups, out_dim, arity):
    """Group-tile size Gt for the block-diagonal packed params.

    Group tiling (Gt < G) needs lane-aligned x/out blocks (Gt % 128 == 0);
    otherwise fall back to a single tile over the whole (small) group axis,
    which bounds the block-diagonal inflation at G x.
    """
    del out_dim, arity
    G = input_groups
    # TODO(synk): for very large out_dim the [V*Gt, Gt*D] packed tile can still
    # be VMEM-heavy; a pure-VPU accumulation variant (no packing) would then be
    # preferable, per the review's optional alternative.
    if G % 128 == 0:
        # Smallest lane-aligned tile -> smallest MXU inflation (Gt x instead of
        # G x) and smallest VMEM-resident packed-parameter tile.
        return 128
    return G


# ----------------------------------------------------------------------------
# Pallas kernel: hoisted hat-basis weights (VPU) + per-vertex bf16 MXU matmuls
# ----------------------------------------------------------------------------
def hoa_kernel(x_ref, p_ref, o_ref, *, arity, n_vertices):
    """One (group-tile, batch-tile) block of the high-order activation.

    x_ref: [arity, bm, Gt] f32   per-coordinate input slabs (groups on lanes)
    p_ref: [V, Gt, Gt*D]   bf16  block-diagonal packed params (act_factor folded)
    o_ref: [bm, Gt*D]      f32
    """
    # Hoisted hat-basis slabs, one (neg, zero, pos) triple per coordinate.
    basis = []
    for j in range(arity):
        xj = x_ref[j]                          # [bm, Gt]
        pos = jnp.maximum(xj, 0.0)             # weight of vertex coord +1
        neg = pos - xj                         # weight of vertex coord -1
        basis.append((neg, 1.0 - pos - neg, pos))
    # TODO(synk): no clamp of x to [-1,1] (linear extrapolation outside), since
    # the reference helper high_order_act_b was not provided in the spec.

    # Vertex weights via shared ternary-prefix products; list index == vertex
    # id sum_j d_j*3^j (d_j = coord_j + 1), matching _compute_vertex_id.
    weights = [None]
    for j in range(arity):
        bj = basis[j]
        weights = [bj[d] if w is None else w * bj[d]
                   for d in range(3) for w in weights]

    # Per-vertex partial matmuls accumulated in f32 registers (no concat
    # temporary, one lane-dense store at the end). The block-diagonal p_ref[v]
    # performs both the vertex contraction and the group -> output-column
    # scatter in a single bf16 MXU pass per vertex.
    acc = None
    for v in range(n_vertices):
        part = jnp.dot(weights[v].astype(jnp.bfloat16), p_ref[v],
                       preferred_element_type=jnp.float32)
        acc = part if acc is None else acc + part
    o_ref[...] = acc.astype(o_ref.dtype)


# ----------------------------------------------------------------------------
# One-time parameter packing (layout plumbing hoisted out of the forward path)
# ----------------------------------------------------------------------------
def pack_params(params, act_factor, group_tile):
    """[G, V, D] -> [G//Gt, V, Gt, Gt*D] block-diagonal bf16 packed params.

    P[n, v, g, g*D + d] = act_factor * params[n*Gt + g, v, d]. Folding
    act_factor and casting to bf16 are exact (entries are +-act_factor or 0).
    """
    G, V, D = params.shape
    Gt = group_tile
    assert G % Gt == 0
    Gn = G // Gt
    p = (params.astype(jnp.float32) * act_factor).reshape(Gn, Gt, V, D)
    p = jnp.transpose(p, (0, 2, 1, 3))                        # [Gn, V, Gt, D]
    eye = jnp.eye(Gt, dtype=jnp.float32)
    blk = eye[None, None, :, :, None] * p[:, :, :, None, :]   # [Gn,V,Gt,Gt,D]
    return blk.reshape(Gn, V, Gt, Gt * D).astype(jnp.bfloat16)


# ----------------------------------------------------------------------------
# Forward wrapper
# ----------------------------------------------------------------------------
def tame_high_order_activation_b_pallas(x, packed_params, *, arity, input_groups,
                                        out_dim, group_tile, block_b=512):
    B, F = x.shape
    A, G, D, Gt = arity, input_groups, out_dim, group_tile
    assert F == G * A
    V = 3 ** A
    Gn = G // Gt
    assert packed_params.shape == (Gn, V, Gt, Gt * D)

    # Only remaining wrapper-side layout pass: [B, G*A] -> [A, B, G] so each
    # coordinate j is a clean [bm, Gt] lane slab in-kernel. No jnp.pad and no
    # output slice: the batch remainder uses Pallas' implicit block padding and
    # the output is written at its natural [B, G*D] shape/layout.
    x_t = jnp.transpose(x.reshape(B, G, A), (2, 0, 1))

    # Batch tile: multiple of 8, large enough to amortize per-step overhead,
    # and >= 2 grid steps so the "parallel" batch axis can shard across the two
    # v7x TensorCores.
    bm = min(block_b, _round_up(B, 8))
    if B >= 16 and pl.cdiv(B, bm) < 2:
        bm = _round_up(pl.cdiv(B, 2), 8)
    nb = pl.cdiv(B, bm)

    # Per-step VMEM footprint: double-buffered x/out blocks + single-buffered
    # packed-param tile; clamp the request so it also fits v7x's 64 MiB VMEM.
    est = (2 * A * bm * Gt * 4 + 2 * bm * Gt * D * 4
           + V * Gt * (Gt * D) * 2 + (1 << 20))
    vmem_limit = int(min(max(2 * est, 16 << 20), 48 << 20))

    kernel = functools.partial(hoa_kernel, arity=A, n_vertices=V)

    def run(single_buffer_params):
        pkw = ({"pipeline_mode": pl.Buffered(1)}
               if single_buffer_params else {})
        return pl.pallas_call(
            kernel,
            out_shape=jax.ShapeDtypeStruct((B, G * D), jnp.float32),
            grid=(Gn, nb),      # batch innermost: the params tile is reused
            in_specs=[          # across the whole batch sweep of a group tile
                pl.BlockSpec((A, bm, Gt), lambda g, i: (0, i, g)),
                pl.BlockSpec((None, V, Gt, Gt * D),
                             lambda g, i: (g, 0, 0, 0), **pkw),
            ],
            out_specs=pl.BlockSpec((bm, Gt * D), lambda g, i: (i, g)),
            compiler_params=pltpu.CompilerParams(
                dimension_semantics=("parallel", "parallel"),
                vmem_limit_bytes=vmem_limit,
            ),
        )(x_t, packed_params)

    try:
        # Single-buffer the packed params (grid-invariant along the inner batch
        # axis), halving their VMEM residency.
        return run(True)
    except Exception:
        # Fallback for jax versions without BlockSpec pipeline_mode support.
        return run(False)


# ----------------------------------------------------------------------------
# Pure-JAX reference (independent of the kernel; full-f32 math)
# ----------------------------------------------------------------------------
def high_order_act_b_ref(x1, params):
    # x1: [B, G, A], params: [G, 3**A, D] -> [B, G, D]
    B, G, A = x1.shape
    V = params.shape[1]
    basis = jnp.stack([jnp.maximum(-x1, 0.0),
                       1.0 - jnp.abs(x1),
                       jnp.maximum(x1, 0.0)], axis=-1)        # [B, G, A, 3]
    ws = []
    for v in range(V):
        wv = jnp.ones((B, G), jnp.float32)
        for j in range(A):
            d = (v // (3 ** j)) % 3
            wv = wv * basis[:, :, j, d]
        ws.append(wv)
    W = jnp.stack(ws, axis=-1)                                # [B, G, V]
    return jnp.sum(W[:, :, :, None] * params[None, :, :, :], axis=2)


def tame_high_order_activation_b_ref(x, params, *, arity, input_groups, out_dim,
                                     act_factor):
    B = x.shape[0]
    x1 = x.reshape(B, input_groups, arity)
    out1 = high_order_act_b_ref(x1, params)
    return out1.reshape(B, input_groups * out_dim) * act_factor


# ----------------------------------------------------------------------------
if __name__ == "__main__":
    arity = 2
    input_groups = 4
    out_dim = 8
    act_factor = 1.5
    batch = 16

    key = jax.random.PRNGKey(0)
    kx, kp = jax.random.split(key)
    x = jax.random.normal(kx, (batch, input_groups * arity), dtype=jnp.float32)

    # Parameter init mirrors the PyTorch __init__ (random +-1, center vertex 0).
    V = 3 ** arity
    params = (jax.random.randint(kp, (input_groups, V, out_dim), 0, 2)
              .astype(jnp.float32) * 2.0 - 1.0)
    params = params.at[:, (V - 1) // 2, :].set(0.0)
    # TODO(synk): project()/project_hard()/project_soft() are parameter-space
    # tameness projections (training-time, not part of the forward pass) and
    # are not implemented here.

    # One-time packing: group-tiled block-diagonal bf16 params, act_factor folded.
    gt = _choose_group_tile(input_groups, out_dim, arity)
    p2 = pack_params(params, act_factor, gt)

    out = tame_high_order_activation_b_pallas(
        x, p2, arity=arity, input_groups=input_groups, out_dim=out_dim,
        group_tile=gt)
    out = jax.block_until_ready(out)

    ref = tame_high_order_activation_b_ref(
        x, params, arity=arity, input_groups=input_groups, out_dim=out_dim,
        act_factor=act_factor)

    assert out.shape == (batch, input_groups * out_dim)
    # Tolerances widened for the bf16 MXU operands (accumulation stays f32;
    # packed params are exact in bf16).
    assert jnp.allclose(out, ref, atol=5e-2, rtol=2e-2), "mismatch vs JAX reference"
    print("KERNEL_OK")
</pallas_src>

<mosaic_0001>
module attributes {stable_mosaic.version = 11 : i64} {
  func.func @hoa_kernel(%arg0: i32, %arg1: i32, %arg2: memref<2x8x4xf32, #tpu.memory_space<vmem>>, %arg3: memref<1x9x4x32xbf16, #tpu.memory_space<vmem>>, %arg4: memref<8x32xf32, #tpu.memory_space<vmem>>) attributes {dimension_semantics = [#tpu.dimension_semantics<parallel>, #tpu.dimension_semantics<parallel>], iteration_bounds = array<i64: 1, 2>, scalar_prefetch = 0 : i64, scratch_operands = 0 : i64, tpu.core_type = #tpu.core_type<tc>, window_params = [{transform_indices = @transform_0, window_bounds = array<i64: 2, 8, 4>}, {pipeline_mode = #tpu.pipeline_mode<synchronous>, transform_indices = @transform_1, window_bounds = array<i64: 1, 9, 4, 32>}, {transform_indices = @transform_2, window_bounds = array<i64: 8, 32>}]} {
    %c0 = arith.constant 0 : index
    %c0_0 = arith.constant 0 : index
    %c0_1 = arith.constant 0 : index
    %0 = vector.load %arg2[%c0, %c0_0, %c0_1] : memref<2x8x4xf32, #tpu.memory_space<vmem>>, vector<1x8x4xf32>
    %1 = vector.shape_cast %0 : vector<1x8x4xf32> to vector<8x4xf32>
    %cst = arith.constant 0.000000e+00 : f32
    %2 = vector.broadcast %cst : f32 to vector<8x4xf32>
    %3 = arith.maximumf %1, %2 : vector<8x4xf32>
    %4 = arith.subf %3, %1 : vector<8x4xf32>
    %cst_2 = arith.constant 1.000000e+00 : f32
    %5 = vector.broadcast %cst_2 : f32 to vector<8x4xf32>
    %6 = arith.subf %5, %3 : vector<8x4xf32>
    %7 = arith.subf %6, %4 : vector<8x4xf32>
    %c1 = arith.constant 1 : index
    %c0_3 = arith.constant 0 : index
    %c0_4 = arith.constant 0 : index
    %8 = vector.load %arg2[%c1, %c0_3, %c0_4] : memref<2x8x4xf32, #tpu.memory_space<vmem>>, vector<1x8x4xf32>
    %9 = vector.shape_cast %8 : vector<1x8x4xf32> to vector<8x4xf32>
    %cst_5 = arith.constant 0.000000e+00 : f32
    %10 = vector.broadcast %cst_5 : f32 to vector<8x4xf32>
    %11 = arith.maximumf %9, %10 : vector<8x4xf32>
    %12 = arith.subf %11, %9 : vector<8x4xf32>
    %cst_6 = arith.constant 1.000000e+00 : f32
    %13 = vector.broadcast %cst_6 : f32 to vector<8x4xf32>
    %14 = arith.subf %13, %11 : vector<8x4xf32>
    %15 = arith.subf %14, %12 : vector<8x4xf32>
    %16 = arith.mulf %4, %12 : vector<8x4xf32>
    %17 = arith.mulf %7, %12 : vector<8x4xf32>
    %18 = arith.mulf %3, %12 : vector<8x4xf32>
    %19 = arith.mulf %4, %15 : vector<8x4xf32>
    %20 = arith.mulf %7, %15 : vector<8x4xf32>
    %21 = arith.mulf %3, %15 : vector<8x4xf32>
    %22 = arith.mulf %4, %11 : vector<8x4xf32>
    %23 = arith.mulf %7, %11 : vector<8x4xf32>
    %24 = arith.mulf %3, %11 : vector<8x4xf32>
    %25 = arith.truncf %16 : vector<8x4xf32> to vector<8x4xbf16>
    %c0_7 = arith.constant 0 : index
    %c0_8 = arith.constant 0 : index
    %c0_9 = arith.constant 0 : index
    %c0_10 = arith.constant 0 : index
    %26 = vector.load %arg3[%c0_7, %c0_8, %c0_9, %c0_10] : memref<1x9x4x32xbf16, #tpu.memory_space<vmem>>, vector<1x1x4x32xbf16>
    %27 = vector.shape_cast %26 : vector<1x1x4x32xbf16> to vector<4x32xbf16>
    %cst_11 = arith.constant dense<0.000000e+00> : vector<8x32xf32>
    %28 = tpu.matmul %25, %27, %cst_11 {dimension_numbers = #tpu.dot_dimension_numbers<[1], [0], [0], [1], [0, 0, 1, 1], [], []>} : vector<8x4xbf16>, vector<4x32xbf16>, vector<8x32xf32> -> vector<8x32xf32>
    %29 = arith.truncf %17 : vector<8x4xf32> to vector<8x4xbf16>
    %c0_12 = arith.constant 0 : index
    %c1_13 = arith.constant 1 : index
    %c0_14 = arith.constant 0 : index
    %c0_15 = arith.constant 0 : index
    %30 = vector.load %arg3[%c0_12, %c1_13, %c0_14, %c0_15] : memref<1x9x4x32xbf16, #tpu.memory_space<vmem>>, vector<1x1x4x32xbf16>
    %31 = vector.shape_cast %30 : vector<1x1x4x32xbf16> to vector<4x32xbf16>
    %cst_16 = arith.constant dense<0.000000e+00> : vector<8x32xf32>
    %32 = tpu.matmul %29, %31, %cst_16 {dimension_numbers = #tpu.dot_dimension_numbers<[1], [0], [0], [1], [0, 0, 1, 1], [], []>} : vector<8x4xbf16>, vector<4x32xbf16>, vector<8x32xf32> -> vector<8x32xf32>
    %33 = arith.addf %28, %32 : vector<8x32xf32>
    %34 = arith.truncf %18 : vector<8x4xf32> to vector<8x4xbf16>
    %c0_17 = arith.constant 0 : index
    %c2 = arith.constant 2 : index
    %c0_18 = arith.constant 0 : index
    %c0_19 = arith.constant 0 : index
    %35 = vector.load %arg3[%c0_17, %c2, %c0_18, %c0_19] : memref<1x9x4x32xbf16, #tpu.memory_space<vmem>>, vector<1x1x4x32xbf16>
    %36 = vector.shape_cast %35 : vector<1x1x4x32xbf16> to vector<4x32xbf16>
    %cst_20 = arith.constant dense<0.000000e+00> : vector<8x32xf32>
    %37 = tpu.matmul %34, %36, %cst_20 {dimension_numbers = #tpu.dot_dimension_numbers<[1], [0], [0], [1], [0, 0, 1, 1], [], []>} : vector<8x4xbf16>, vector<4x32xbf16>, vector<8x32xf32> -> vector<8x32xf32>
    %38 = arith.addf %33, %37 : vector<8x32xf32>
    %39 = arith.truncf %19 : vector<8x4xf32> to vector<8x4xbf16>
    %c0_21 = arith.constant 0 : index
    %c3 = arith.constant 3 : index
    %c0_22 = arith.constant 0 : index
    %c0_23 = arith.constant 0 : index
    %40 = vector.load %arg3[%c0_21, %c3, %c0_22, %c0_23] : memref<1x9x4x32xbf16, #tpu.memory_space<vmem>>, vector<1x1x4x32xbf16>
    %41 = vector.shape_cast %40 : vector<1x1x4x32xbf16> to vector<4x32xbf16>
    %cst_24 = arith.constant dense<0.000000e+00> : vector<8x32xf32>
    %42 = tpu.matmul %39, %41, %cst_24 {dimension_numbers = #tpu.dot_dimension_numbers<[1], [0], [0], [1], [0, 0, 1, 1], [], []>} : vector<8x4xbf16>, vector<4x32xbf16>, vector<8x32xf32> -> vector<8x32xf32>
    %43 = arith.addf %38, %42 : vector<8x32xf32>
    %44 = arith.truncf %20 : vector<8x4xf32> to vector<8x4xbf16>
    %c0_25 = arith.constant 0 : index
    %c4 = arith.constant 4 : index
    %c0_26 = arith.constant 0 : index
    %c0_27 = arith.constant 0 : index
    %45 = vector.load %arg3[%c0_25, %c4, %c0_26, %c0_27] : memref<1x9x4x32xbf16, #tpu.memory_space<vmem>>, vector<1x1x4x32xbf16>
    %46 = vector.shape_cast %45 : vector<1x1x4x32xbf16> to vector<4x32xbf16>
    %cst_28 = arith.constant dense<0.000000e+00> : vector<8x32xf32>
    %47 = tpu.matmul %44, %46, %cst_28 {dimension_numbers = #tpu.dot_dimension_numbers<[1], [0], [0], [1], [0, 0, 1, 1], [], []>} : vector<8x4xbf16>, vector<4x32xbf16>, vector<8x32xf32> -> vector<8x32xf32>
    %48 = arith.addf %43, %47 : vector<8x32xf32>
    %49 = arith.truncf %21 : vector<8x4xf32> to vector<8x4xbf16>
    %c0_29 = arith.constant 0 : index
    %c5 = arith.constant 5 : index
    %c0_30 = arith.constant 0 : index
    %c0_31 = arith.constant 0 : index
    %50 = vector.load %arg3[%c0_29, %c5, %c0_30, %c0_31] : memref<1x9x4x32xbf16, #tpu.memory_space<vmem>>, vector<1x1x4x32xbf16>
    %51 = vector.shape_cast %50 : vector<1x1x4x32xbf16> to vector<4x32xbf16>
    %cst_32 = arith.constant dense<0.000000e+00> : vector<8x32xf32>
    %52 = tpu.matmul %49, %51, %cst_32 {dimension_numbers = #tpu.dot_dimension_numbers<[1], [0], [0], [1], [0, 0, 1, 1], [], []>} : vector<8x4xbf16>, vector<4x32xbf16>, vector<8x32xf32> -> vector<8x32xf32>
    %53 = arith.addf %48, %52 : vector<8x32xf32>
    %54 = arith.truncf %22 : vector<8x4xf32> to vector<8x4xbf16>
    %c0_33 = arith.constant 0 : index
    %c6 = arith.constant 6 : index
    %c0_34 = arith.constant 0 : index
    %c0_35 = arith.constant 0 : index
    %55 = vector.load %arg3[%c0_33, %c6, %c0_34, %c0_35] : memref<1x9x4x32xbf16, #tpu.memory_space<vmem>>, vector<1x1x4x32xbf16>
    %56 = vector.shape_cast %55 : vector<1x1x4x32xbf16> to vector<4x32xbf16>
    %cst_36 = arith.constant dense<0.000000e+00> : vector<8x32xf32>
    %57 = tpu.matmul %54, %56, %cst_36 {dimension_numbers = #tpu.dot_dimension_numbers<[1], [0], [0], [1], [0, 0, 1, 1], [], []>} : vector<8x4xbf16>, vector<4x32xbf16>, vector<8x32xf32> -> vector<8x32xf32>
    %58 = arith.addf %53, %57 : vector<8x32xf32>
    %59 = arith.truncf %23 : vector<8x4xf32> to vector<8x4xbf16>
    %c0_37 = arith.constant 0 : index
    %c7 = arith.constant 7 : index
    %c0_38 = arith.constant 0 : index
    %c0_39 = arith.constant 0 : index
    %60 = vector.load %arg3[%c0_37, %c7, %c0_38, %c0_39] : memref<1x9x4x32xbf16, #tpu.memory_space<vmem>>, vector<1x1x4x32xbf16>
    %61 = vector.shape_cast %60 : vector<1x1x4x32xbf16> to vector<4x32xbf16>
    %cst_40 = arith.constant dense<0.000000e+00> : vector<8x32xf32>
    %62 = tpu.matmul %59, %61, %cst_40 {dimension_numbers = #tpu.dot_dimension_numbers<[1], [0], [0], [1], [0, 0, 1, 1], [], []>} : vector<8x4xbf16>, vector<4x32xbf16>, vector<8x32xf32> -> vector<8x32xf32>
    %63 = arith.addf %58, %62 : vector<8x32xf32>
    %64 = arith.truncf %24 : vector<8x4xf32> to vector<8x4xbf16>
    %c0_41 = arith.constant 0 : index
    %c8 = arith.constant 8 : index
    %c0_42 = arith.constant 0 : index
    %c0_43 = arith.constant 0 : index
    %65 = vector.load %arg3[%c0_41, %c8, %c0_42, %c0_43] : memref<1x9x4x32xbf16, #tpu.memory_space<vmem>>, vector<1x1x4x32xbf16>
    %66 = vector.shape_cast %65 : vector<1x1x4x32xbf16> to vector<4x32xbf16>
    %cst_44 = arith.constant dense<0.000000e+00> : vector<8x32xf32>
    %67 = tpu.matmul %64, %66, %cst_44 {dimension_numbers = #tpu.dot_dimension_numbers<[1], [0], [0], [1], [0, 0, 1, 1], [], []>} : vector<8x4xbf16>, vector<4x32xbf16>, vector<8x32xf32> -> vector<8x32xf32>
    %68 = arith.addf %63, %67 : vector<8x32xf32>
    %c0_45 = arith.constant 0 : index
    %c0_46 = arith.constant 0 : index
    %69 = vector.load %arg4[%c0_45, %c0_46] : memref<8x32xf32, #tpu.memory_space<vmem>>, vector<8x32xf32>
    tpu.vector_store %arg4[%c0_45, %c0_46], %68 {strides = array<i32>} : memref<8x32xf32, #tpu.memory_space<vmem>>, vector<8x32xf32>,
    return
  }
  func.func @transform_0(%arg0: i32, %arg1: i32) -> (i32, i32, i32) {
    %c0_i32 = arith.constant 0 : i32
    %c0_i32_0 = arith.constant 0 : i32
    return %c0_i32, %arg1, %arg0 : i32, i32, i32
  }
  func.func @transform_1(%arg0: i32, %arg1: i32) -> (i32, i32, i32, i32) {
    %c0_i32 = arith.constant 0 : i32
    %c0_i32_0 = arith.constant 0 : i32
    %c0_i32_1 = arith.constant 0 : i32
    %c0_i32_2 = arith.constant 0 : i32
    return %arg0, %c0_i32, %c0_i32_0, %c0_i32_1 : i32, i32, i32, i32
  }
  func.func @transform_2(%arg0: i32, %arg1: i32) -> (i32, i32) {
    %c0_i32 = arith.constant 0 : i32
    return %arg1, %arg0 : i32, i32
  }
}

module attributes {stable_mosaic.version = 11 : i64} {
  func.func @hoa_kernel(%arg0: i32, %arg1: i32, %arg2: memref<2x8x4xf32, #tpu.memory_space<vmem>>, %arg3: memref<1x9x4x32xbf16, #tpu.memory_space<vmem>>, %arg4: memref<8x32xf32, #tpu.memory_space<vmem>>) attributes {dimension_semantics = [#tpu.dimension_semantics<parallel>, #tpu.dimension_semantics<parallel>], iteration_bounds = array<i64: 1, 2>, scalar_prefetch = 0 : i64, scratch_operands = 0 : i64, tpu.core_type = #tpu.core_type<tc>, window_params = [{transform_indices = @transform_0, window_bounds = array<i64: 2, 8, 4>}, {transform_indices = @transform_1, window_bounds = array<i64: 1, 9, 4, 32>}, {transform_indices = @transform_2, window_bounds = array<i64: 8, 32>}]} {
    %c0 = arith.constant 0 : index
    %c0_0 = arith.constant 0 : index
    %c0_1 = arith.constant 0 : index
    %0 = vector.load %arg2[%c0, %c0_0, %c0_1] : memref<2x8x4xf32, #tpu.memory_space<vmem>>, vector<1x8x4xf32>
    %1 = vector.shape_cast %0 : vector<1x8x4xf32> to vector<8x4xf32>
    %cst = arith.constant 0.000000e+00 : f32
    %2 = vector.broadcast %cst : f32 to vector<8x4xf32>
    %3 = arith.maximumf %1, %2 : vector<8x4xf32>
    %4 = arith.subf %3, %1 : vector<8x4xf32>
    %cst_2 = arith.constant 1.000000e+00 : f32
    %5 = vector.broadcast %cst_2 : f32 to vector<8x4xf32>
    %6 = arith.subf %5, %3 : vector<8x4xf32>
    %7 = arith.subf %6, %4 : vector<8x4xf32>
    %c1 = arith.constant 1 : index
    %c0_3 = arith.constant 0 : index
    %c0_4 = arith.constant 0 : index
    %8 = vector.load %arg2[%c1, %c0_3, %c0_4] : memref<2x8x4xf32, #tpu.memory_space<vmem>>, vector<1x8x4xf32>
    %9 = vector.shape_cast %8 : vector<1x8x4xf32> to vector<8x4xf32>
    %cst_5 = arith.constant 0.000000e+00 : f32
    %10 = vector.broadcast %cst_5 : f32 to vector<8x4xf32>
    %11 = arith.maximumf %9, %10 : vector<8x4xf32>
    %12 = arith.subf %11, %9 : vector<8x4xf32>
    %cst_6 = arith.constant 1.000000e+00 : f32
    %13 = vector.broadcast %cst_6 : f32 to vector<8x4xf32>
    %14 = arith.subf %13, %11 : vector<8x4xf32>
    %15 = arith.subf %14, %12 : vector<8x4xf32>
    %16 = arith.mulf %4, %12 : vector<8x4xf32>
    %17 = arith.mulf %7, %12 : vector<8x4xf32>
    %18 = arith.mulf %3, %12 : vector<8x4xf32>
    %19 = arith.mulf %4, %15 : vector<8x4xf32>
    %20 = arith.mulf %7, %15 : vector<8x4xf32>
    %21 = arith.mulf %3, %15 : vector<8x4xf32>
    %22 = arith.mulf %4, %11 : vector<8x4xf32>
    %23 = arith.mulf %7, %11 : vector<8x4xf32>
    %24 = arith.mulf %3, %11 : vector<8x4xf32>
    %25 = arith.truncf %16 : vector<8x4xf32> to vector<8x4xbf16>
    %c0_7 = arith.constant 0 : index
    %c0_8 = arith.constant 0 : index
    %c0_9 = arith.constant 0 : index
    %c0_10 = arith.constant 0 : index
    %26 = vector.load %arg3[%c0_7, %c0_8, %c0_9, %c0_10] : memref<1x9x4x32xbf16, #tpu.memory_space<vmem>>, vector<1x1x4x32xbf16>
    %27 = vector.shape_cast %26 : vector<1x1x4x32xbf16> to vector<4x32xbf16>
    %cst_11 = arith.constant dense<0.000000e+00> : vector<8x32xf32>
    %28 = tpu.matmul %25, %27, %cst_11 {dimension_numbers = #tpu.dot_dimension_numbers<[1], [0], [0], [1], [0, 0, 1, 1], [], []>} : vector<8x4xbf16>, vector<4x32xbf16>, vector<8x32xf32> -> vector<8x32xf32>
    %29 = arith.truncf %17 : vector<8x4xf32> to vector<8x4xbf16>
    %c0_12 = arith.constant 0 : index
    %c1_13 = arith.constant 1 : index
    %c0_14 = arith.constant 0 : index
    %c0_15 = arith.constant 0 : index
    %30 = vector.load %arg3[%c0_12, %c1_13, %c0_14, %c0_15] : memref<1x9x4x32xbf16, #tpu.memory_space<vmem>>, vector<1x1x4x32xbf16>
    %31 = vector.shape_cast %30 : vector<1x1x4x32xbf16> to vector<4x32xbf16>
    %cst_16 = arith.constant dense<0.000000e+00> : vector<8x32xf32>
    %32 = tpu.matmul %29, %31, %cst_16 {dimension_numbers = #tpu.dot_dimension_numbers<[1], [0], [0], [1], [0, 0, 1, 1], [], []>} : vector<8x4xbf16>, vector<4x32xbf16>, vector<8x32xf32> -> vector<8x32xf32>
    %33 = arith.addf %28, %32 : vector<8x32xf32>
    %34 = arith.truncf %18 : vector<8x4xf32> to vector<8x4xbf16>
    %c0_17 = arith.constant 0 : index
    %c2 = arith.constant 2 : index
    %c0_18 = arith.constant 0 : index
    %c0_19 = arith.constant 0 : index
    %35 = vector.load %arg3[%c0_17, %c2, %c0_18, %c0_19] : memref<1x9x4x32xbf16, #tpu.memory_space<vmem>>, vector<1x1x4x32xbf16>
    %36 = vector.shape_cast %35 : vector<1x1x4x32xbf16> to vector<4x32xbf16>
    %cst_20 = arith.constant dense<0.000000e+00> : vector<8x32xf32>
    %37 = tpu.matmul %34, %36, %cst_20 {dimension_numbers = #tpu.dot_dimension_numbers<[1], [0], [0], [1], [0, 0, 1, 1], [], []>} : vector<8x4xbf16>, vector<4x32xbf16>, vector<8x32xf32> -> vector<8x32xf32>
    %38 = arith.addf %33, %37 : vector<8x32xf32>
    %39 = arith.truncf %19 : vector<8x4xf32> to vector<8x4xbf16>
    %c0_21 = arith.constant 0 : index
    %c3 = arith.constant 3 : index
    %c0_22 = arith.constant 0 : index
    %c0_23 = arith.constant 0 : index
    %40 = vector.load %arg3[%c0_21, %c3, %c0_22, %c0_23] : memref<1x9x4x32xbf16, #tpu.memory_space<vmem>>, vector<1x1x4x32xbf16>
    %41 = vector.shape_cast %40 : vector<1x1x4x32xbf16> to vector<4x32xbf16>
    %cst_24 = arith.constant dense<0.000000e+00> : vector<8x32xf32>
    %42 = tpu.matmul %39, %41, %cst_24 {dimension_numbers = #tpu.dot_dimension_numbers<[1], [0], [0], [1], [0, 0, 1, 1], [], []>} : vector<8x4xbf16>, vector<4x32xbf16>, vector<8x32xf32> -> vector<8x32xf32>
    %43 = arith.addf %38, %42 : vector<8x32xf32>
    %44 = arith.truncf %20 : vector<8x4xf32> to vector<8x4xbf16>
    %c0_25 = arith.constant 0 : index
    %c4 = arith.constant 4 : index
    %c0_26 = arith.constant 0 : index
    %c0_27 = arith.constant 0 : index
    %45 = vector.load %arg3[%c0_25, %c4, %c0_26, %c0_27] : memref<1x9x4x32xbf16, #tpu.memory_space<vmem>>, vector<1x1x4x32xbf16>
    %46 = vector.shape_cast %45 : vector<1x1x4x32xbf16> to vector<4x32xbf16>
    %cst_28 = arith.constant dense<0.000000e+00> : vector<8x32xf32>
    %47 = tpu.matmul %44, %46, %cst_28 {dimension_numbers = #tpu.dot_dimension_numbers<[1], [0], [0], [1], [0, 0, 1, 1], [], []>} : vector<8x4xbf16>, vector<4x32xbf16>, vector<8x32xf32> -> vector<8x32xf32>
    %48 = arith.addf %43, %47 : vector<8x32xf32>
    %49 = arith.truncf %21 : vector<8x4xf32> to vector<8x4xbf16>
    %c0_29 = arith.constant 0 : index
    %c5 = arith.constant 5 : index
    %c0_30 = arith.constant 0 : index
    %c0_31 = arith.constant 0 : index
    %50 = vector.load %arg3[%c0_29, %c5, %c0_30, %c0_31] : memref<1x9x4x32xbf16, #tpu.memory_space<vmem>>, vector<1x1x4x32xbf16>
    %51 = vector.shape_cast %50 : vector<1x1x4x32xbf16> to vector<4x32xbf16>
    %cst_32 = arith.constant dense<0.000000e+00> : vector<8x32xf32>
    %52 = tpu.matmul %49, %51, %cst_32 {dimension_numbers = #tpu.dot_dimension_numbers<[1], [0], [0], [1], [0, 0, 1, 1], [], []>} : vector<8x4xbf16>, vector<4x32xbf16>, vector<8x32xf32> -> vector<8x32xf32>
    %53 = arith.addf %48, %52 : vector<8x32xf32>
    %54 = arith.truncf %22 : vector<8x4xf32> to vector<8x4xbf16>
    %c0_33 = arith.constant 0 : index
    %c6 = arith.constant 6 : index
    %c0_34 = arith.constant 0 : index
    %c0_35 = arith.constant 0 : index
    %55 = vector.load %arg3[%c0_33, %c6, %c0_34, %c0_35] : memref<1x9x4x32xbf16, #tpu.memory_space<vmem>>, vector<1x1x4x32xbf16>
    %56 = vector.shape_cast %55 : vector<1x1x4x32xbf16> to vector<4x32xbf16>
    %cst_36 = arith.constant dense<0.000000e+00> : vector<8x32xf32>
    %57 = tpu.matmul %54, %56, %cst_36 {dimension_numbers = #tpu.dot_dimension_numbers<[1], [0], [0], [1], [0, 0, 1, 1], [], []>} : vector<8x4xbf16>, vector<4x32xbf16>, vector<8x32xf32> -> vector<8x32xf32>
    %58 = arith.addf %53, %57 : vector<8x32xf32>
    %59 = arith.truncf %23 : vector<8x4xf32> to vector<8x4xbf16>
    %c0_37 = arith.constant 0 : index
    %c7 = arith.constant 7 : index
    %c0_38 = arith.constant 0 : index
    %c0_39 = arith.constant 0 : index
    %60 = vector.load %arg3[%c0_37, %c7, %c0_38, %c0_39] : memref<1x9x4x32xbf16, #tpu.memory_space<vmem>>, vector<1x1x4x32xbf16>
    %61 = vector.shape_cast %60 : vector<1x1x4x32xbf16> to vector<4x32xbf16>
    %cst_40 = arith.constant dense<0.000000e+00> : vector<8x32xf32>
    %62 = tpu.matmul %59, %61, %cst_40 {dimension_numbers = #tpu.dot_dimension_numbers<[1], [0], [0], [1], [0, 0, 1, 1], [], []>} : vector<8x4xbf16>, vector<4x32xbf16>, vector<8x32xf32> -> vector<8x32xf32>
    %63 = arith.addf %58, %62 : vector<8x32xf32>
    %64 = arith.truncf %24 : vector<8x4xf32> to vector<8x4xbf16>
    %c0_41 = arith.constant 0 : index
    %c8 = arith.constant 8 : index
    %c0_42 = arith.constant 0 : index
    %c0_43 = arith.constant 0 : index
    %65 = vector.load %arg3[%c0_41, %c8, %c0_42, %c0_43] : memref<1x9x4x32xbf16, #tpu.memory_space<vmem>>, vector<1x1x4x32xbf16>
    %66 = vector.shape_cast %65 : vector<1x1x4x32xbf16> to vector<4x32xbf16>
    %cst_44 = arith.constant dense<0.000000e+00> : vector<8x32xf32>
    %67 = tpu.matmul %64, %66, %cst_44 {dimension_numbers = #tpu.dot_dimension_numbers<[1], [0], [0], [1], [0, 0, 1, 1], [], []>} : vector<8x4xbf16>, vector<4x32xbf16>, vector<8x32xf32> -> vector<8x32xf32>
    %68 = arith.addf %63, %67 : vector<8x32xf32>
    %c0_45 = arith.constant 0 : index
    %c0_46 = arith.constant 0 : index
    %69 = vector.load %arg4[%c0_45, %c0_46] : memref<8x32xf32, #tpu.memory_space<vmem>>, vector<8x32xf32>
    tpu.vector_store %arg4[%c0_45, %c0_46], %68 {strides = array<i32>} : memref<8x32xf32, #tpu.memory_space<vmem>>, vector<8x32xf32>,
    return
  }
  func.func @transform_0(%arg0: i32, %arg1: i32) -> (i32, i32, i32) {
    %c0_i32 = arith.constant 0 : i32
    %c0_i32_0 = arith.constant 0 : i32
    return %c0_i32, %arg1, %arg0 : i32, i32, i32
  }
  func.func @transform_1(%arg0: i32, %arg1: i32) -> (i32, i32, i32, i32) {
    %c0_i32 = arith.constant 0 : i32
    %c0_i32_0 = arith.constant 0 : i32
    %c0_i32_1 = arith.constant 0 : i32
    %c0_i32_2 = arith.constant 0 : i32
    return %arg0, %c0_i32, %c0_i32_0, %c0_i32_1 : i32, i32, i32, i32
  }
  func.func @transform_2(%arg0: i32, %arg1: i32) -> (i32, i32) {
    %c0_i32 = arith.constant 0 : i32
    return %arg1, %arg0 : i32, i32
  }
}

</mosaic_0001>

<bundles_post_ra>
// kernel: tpu_custom_call.1
= control target key start
LH: loop header
LB: loop body
LE: loop exit
PB: predicated region body
PF: predicated region fallthrough
CT: control target
= control target key end

     0   :  { %7 = vsyncpa [#allocation4], 0  ;;  %s888_s0 = inlined_call_operand.vmem [shape: f32[2,16,4], index: 0, kind: input, shape index: {}]   ;;  %s889_s1 = inlined_call_operand.vmem [shape: bf16[1,9,4,32], index: 1, kind: input, shape index: {}]   ;;  %s890_s2 = inlined_call_operand.hbm [shape: f32[16,32], index: 2, kind: output, shape index: {}]  }
   0x1   :  { %9 = vsyncpa [#allocation4 + $0x1], 0  ;;  %s736_s9 = smov 0   ;;  %s738_s10 = smov 0  }
   0x2   :  { %s740_s11 = smov 0   ;;  %s742_s12 = smov 0  }
   0x3   :  { %s744_s13 = smov 0   ;;  %s746_s14 = smov 0  }
   0x4 LB: > { %s554_s15 = sadd.s32 4294967295, %s719_s14   ;;  %s555_s16 = sadd.s32 4294967294, %s719_s14   ;;  %s719_s14 = sphi %s746_s14, %s15_s14   ;;  %s715_s13 = sphi %s744_s13, %s897_s13   ;;  %s711_s12 = sphi %s742_s12, %s896_s12   ;;  %s707_s11 = sphi %s740_s11, %s895_s11   ;;  %s703_s10 = sphi %s738_s10, %s894_s10   ;;  %s699_s9 = sphi %s736_s9, %s893_s9  }
   0x5   : > { %s24_s17 = sadd.s32 1, %s715_s13  ;;  %s36_s18 = sadd.s32 1, %s707_s11 }
   0x6   : > { %p25_p0 = scmp.ge.s32.totalorder %s24_s17, 2  ;;  %p43_p1 = scmp.ne.s32.totalorder %s707_s11, %s703_s10 }
   0x7   : > { %p44_p2 = scmp.eq.s32.totalorder %s719_s14, 0  ;;  %p101_p3 = scmp.eq.s32.totalorder %s554_s15, 1 }
   0x8   : > { %s899_s17 = smov (%p25_p0, %s24_s17), 0  ;;  %p106_p6 = scmp.ne.s32.totalorder %s703_s10, %s699_s9 }
   0x9   : > { %p45_p4 = por %p44_p2, %p43_p1  ;;  %p775_p5 = por %p101_p3, %p43_p1 }
   0xa   : > { %s31_s20 = ssub.s32 %s715_s13, %s899_s17  ;;  %p107_p8 = scmp.eq.s32.totalorder %s555_s16, 1 }
   0xb   : > { %p34_p7 = scmp.eq.s32.totalorder %s31_s20, 0  ;;  %p558_p10 = scmp.ge.s32.totalorder %s719_s14, 2 }
   0xc   : > { %p786_p9 = por %p107_p8, %p106_p6 }
   0xd   : > { %s784_s21 = scalar_select %p34_p7, %s707_s11, %s36_s18  }
   0xe   : > { %131 = sbr.rel (%p558_p10) target bundleno = 25 (0x19), region = 20 }
  0x13   : > { %134 = sbr.rel (!%p45_p4) target bundleno = 25 (0x19), region = 24  ;;  %s136_s23 = sand.u32 (%p45_p4), 1, %s707_s11  }
  0x14   : > { %s560_s24 = sshll.u32 (%p45_p4), %s715_s13, 3  ;;  %s559_s25 = sshll.u32 (%p45_p4), %s136_s23, 4 }
  0x15   : > { %s141_s28 = scalar_lea.vmem (%p45_p4), %s888_s0, %s560_s24  ;;  %s138_s29 = scalar_lea.vmem (%p45_p4), [#allocation2], %s559_s25 }
  0x16   : > { %v172_v0 = vld [vmem:[%s141_s28] sm:$0xff] (%p45_p4)  ;;  %v174_v1 = vld [vmem:[%s141_s28 + $0x10] sm:$0xff] (%p45_p4) }
  0x17   : > { %173 = vst [vmem:[%s138_s29] sm:$0xff] (%p45_p4), %v172_v0 }
  0x18   : > { %175 = vst [vmem:[%s138_s29 + $0x8] sm:$0xff] %v174_v1 }
  0x19 PF: > { %p561_p11 = scmp.ge.s32.totalorder %s719_s14, 1  ;;  %p180_p12 = scmp.lt.s32.totalorder %s719_s14, 3 }
  0x1b   : > { %p181_p13 = pnand %p561_p11, %p180_p12 }
  0x1c   : > { %s807_s6 = sand.u32 (!%p181_p13), 1, %s703_s10   ;;  %s583_s5 = sshll.u32 (!%p181_p13), %s711_s12, 3 }
  0x1d   : > { %184 = sbr.rel (%p181_p13) target bundleno = 214 (0xd6), region = 62  ;;  %s562_s18 = sshll.u32 (!%p181_p13), %s807_s6, 4 }
  0x1e   : > { %s189_s28 = scalar_lea.vmem (!%p181_p13), [#allocation2], %s562_s18  ;;  %s563_s7 = sshll.u32 (!%p181_p13), %s807_s6, 3 }
  0x1f   : > { %s459_s16 = scalar_lea.hbm (!%p181_p13), %s890_s2, %s583_s5  ;;  %s212_s18 = scalar_lea.vmem (!%p181_p13), [#allocation3], %s563_s7 }
  0x20   : > { %s461_s20 = sshll.u32 (!%p181_p13), %s212_s18, 4  ;;  %s463_s23 = sshll.u32 (!%p181_p13), %s459_s16, 4  ;;  %s462_s20 = int_to_ptr.vmem [resolvable:$true] %s461_s20  ;;  %s464_s23 = int_to_ptr.hbm [resolvable:$true] %s463_s23 }
  0x21   : > { %s448_s12 = scalar_lea.sflag (!%p181_p13), [#allocation4], %s807_s6  ;;  %s655_s24 = sshra.s32 (!%p181_p13), %s464_s23, 4  ;;  %s656_s24 = int_to_ptr.hbm [resolvable:$true] %s655_s24 }
  0x22   : > { %vm248_vm0 = vcmask 1041408   ;;  %v568_v2 = vld [vmem:[%s889_s1 + $0x4] sm:$0x3]  ;;  %v565_v3 = vld [vmem:[%s889_s1 + $0x2] sm:$0x3]  ;;  %v564_v15 = vld [vmem:[%s189_s28 + $0x8] sm:$0xff]  ;;  %p662_p3 = scmp.lt.s32.totalorder %s656_s24, %s890_s2 }
  0x23   : > { %v291_v4 = vsel %vm248_vm0, %v568_v2, 0  ;;  %v250_v5 = vsel %vm248_vm0, %v565_v3, 0  ;;  %v240_v6 = vld [vmem:[%s889_s1] sm:$0x3]  ;;  %v570_v7 = vld [vmem:[%s889_s1 + $0x6] sm:$0x3] }
  0x24   : > { %300 = vmatpush.bf16.msra.mxu2 %v291_v4  ;;  %259 = vmatpush.bf16.msra.mxu0 %v250_v5  ;;  %v269_v8 = vsel %vm248_vm0, %v240_v6, 0  ;;  %v314_v9 = vsel %vm248_vm0, %v570_v7, 0  ;;  %v572_v10 = vld [vmem:[%s889_s1 + $0x8] sm:$0x3]  ;;  %v576_v12 = vld [vmem:[%s889_s1 + $0xc] sm:$0x3] }
  0x25   : > { %278 = vmatpush.bf16.msra.mxu1 %v269_v8  ;;  %323 = vmatpush.bf16.msra.mxu3 %v314_v9  ;;  %v337_v11 = vsel %vm248_vm0, %v572_v10, 0  ;;  %v578_v13 = vld [vmem:[%s889_s1 + $0xe] sm:$0x3]  ;;  %v219_v14 = vld [vmem:[%s189_s28] sm:$0xff]  ;;  %v383_v16 = vsel %vm248_vm0, %v576_v12, 0  ;;  %v226_v20 = vmax.f32 %v564_v15, 0.0 }
  0x26   : > { %v406_v17 = vsel %vm248_vm0, %v578_v13, 0  ;;  %v574_v18 = vld [vmem:[%s889_s1 + $0xa] sm:$0x3]  ;;  %v220_v19 = vmax.f32 %v219_v14, 0.0  ;;  %vm244_vm1 = vcmask 31744   ;;  %vm445_vm2 = vcmask 261120  }
  0x27   : > { %v360_v21 = vsel %vm248_vm0, %v574_v18, 0  ;;  %v227_v23 = vsub.f32 %v226_v20, %v564_v15  ;;  %v228_v25 = vsub.f32 1.0, %v226_v20  ;;  %v580_v30 = vld [vmem:[%s889_s1 + $0x10] sm:$0x3]  ;;  %s657_s25 = scalar_lea.hbm %s656_s24, 8  ;;  %s661_s28 = scalar_lea.hbm %s890_s2, 16 }
  0x28   : > { %346 = vmatpush.bf16.msrb.mxu0 %v337_v11  ;;  %392 = vmatpush.bf16.msrb.mxu2 %v383_v16  ;;  %v221_v22 = vsub.f32 %v220_v19, %v219_v14  ;;  %v222_v24 = vsub.f32 1.0, %v220_v19  ;;  %v429_v37 = vsel %vm248_vm0, %v580_v30, 0  ;;  %v238_v46 = vmul.f32 %v226_v20, %v220_v19  ;;  %p658_p0 = scmp.ne.s32.totalorder %s656_s24, %s657_s25  ;;  %p663_p4 = scmp.lt.s32.totalorder %s661_s28, %s657_s25 }
  0x29   : > { %415 = vmatpush.bf16.msrb.mxu3 %v406_v17  ;;  %369 = vmatpush.bf16.msrb.mxu1 %v360_v21  ;;  %v232_v26 = vmul.f32 %v227_v23, %v220_v19  ;;  %v229_v29 = vsub.f32 %v228_v25, %v227_v23 }
  0x2a   : > { %v223_v27 = vsub.f32 %v222_v24, %v221_v22  ;;  %v230_v28 = vmul.f32 %v227_v23, %v221_v22  ;;  %v236_v38 = vmul.f32 %v226_v20, %v221_v22  ;;  %v422_v47 = vpack.c.bf16 %v238_v46, %v238_v46  ;;  %p659_p1 = pnand %p658_p0, %p775_p5  ;;  %p664_p6 = por %p663_p4, %p662_p3 }
  0x2b   : > { %v284_v31 = vpack.c.bf16 %v232_v26, %v232_v26  ;;  %v233_v34 = vmul.f32 %v229_v29, %v221_v22  ;;  %v235_v39 = vmul.f32 %v229_v29, %v220_v19 }
  0x2c   : > { %v231_v32 = vmul.f32 %v227_v23, %v223_v27  ;;  %v239_v33 = vpack.c.bf16 %v230_v28, %v230_v28  ;;  %v234_v40 = vmul.f32 %v229_v29, %v223_v27  ;;  %v237_v41 = vmul.f32 %v226_v20, %v223_v27  ;;  %p660_p2 = pneg %p659_p1 }
  0x2d   : > { %569 = vmatmul.msk.bf16.vlgmr.msra.gmra.mxu2 %vm244_vm1, %v284_v31  ;;  %v307_v36 = vpack.c.bf16 %v233_v34, %v233_v34  ;;  %v376_v42 = vpack.c.bf16 %v236_v38, %v236_v38  ;;  %v353_v43 = vpack.c.bf16 %v235_v39, %v235_v39 }
  0x2e   : > { %v241_v35 = vpack.c.bf16 %v231_v32, %v231_v32  ;;  %567 = vmatmul.msk.bf16.vlgmr.msra.gmra.mxu1 %vm244_vm1, %v239_v33  ;;  %v330_v44 = vpack.c.bf16 %v234_v40, %v234_v40  ;;  %v399_v45 = vpack.c.bf16 %v237_v41, %v237_v41  ;;  %p665_p7 = pnand %p664_p6, %p660_p2 }
  0x2f   : > { %571 = vmatmul.msk.bf16.vlgmr.msra.gmra.mxu3 %vm244_vm1, %v307_v36 }
  0x30   : > { %566 = vmatmul.msk.bf16.vlgmr.msra.gmra.mxu0 %vm244_vm1, %v241_v35 }
  0x31   : > { %438 = vmatpush.bf16.msra.mxu0 %v429_v37 }
  0x3d   : > { %577 = vmatmul.msk.bf16.vlgmr.msrb.gmra.mxu2 %vm244_vm1, %v376_v42 }
  0x3e   : > { %575 = vmatmul.msk.bf16.vlgmr.msrb.gmra.mxu1 %vm244_vm1, %v353_v43 }
  0x3f   : > { %579 = vmatmul.msk.bf16.vlgmr.msrb.gmra.mxu3 %vm244_vm1, %v399_v45 }
  0x40   : > { %573 = vmatmul.msk.bf16.vlgmr.msrb.gmra.mxu0 %vm244_vm1, %v330_v44 }
  0x50   : > { %581 = vmatmul.msk.bf16.vlgmr.msra.gmra.mxu0 %vm244_vm1, %v422_v47 }
  0xab   : > { %v280_v48 = vpop.f32.mrf.mxu1 }
  0xad   : > { %v261_v49 = vpop.f32.mrf.mxu0 }
  0xae   : > { %v281_v54 = vadd.f32 %v280_v48, %v261_v49 }
  0xb0   : > { %v302_v50 = vpop.f32.mrf.mxu2 }
  0xb1   : > { %v306_v56 = vadd.f32 %v302_v50, %v281_v54 }
  0xb2   : > { %v325_v51 = vpop.f32.mrf.mxu3 }
  0xb3   : > { %v282_v52 = vpop.f32.mrf.mxu1  ;;  %v329_v60 = vadd.f32 %v325_v51, %v306_v56 }
  0xb5   : > { %v263_v53 = vpop.f32.mrf.mxu0 }
  0xb8   : > { %v304_v55 = vpop.f32.mrf.mxu2 }
  0xba   : > { %v327_v57 = vpop.f32.mrf.mxu3 }
  0xbb   : > { %v371_v58 = vpop.f32.mrf.mxu1 }
  0xbd   : > { %v348_v59 = vpop.f32.mrf.mxu0 }
  0xbe   : > { %v352_v61 = vadd.f32 %v348_v59, %v329_v60 }
  0xc0   : > { %v394_v62 = vpop.f32.mrf.mxu2  ;;  %v375_v1 = vadd.f32 %v371_v58, %v352_v61 }
  0xc2   : > { %v417_v63 = vpop.f32.mrf.mxu3  ;;  %v398_v3 = vadd.f32 %v394_v62, %v375_v1 }
  0xc3   : > { %v373_v0 = vpop.f32.mrf.mxu1 }
  0xc4   : > { %v421_v6 = vadd.f32 %v417_v63, %v398_v3 }
  0xc5   : > { %v350_v2 = vpop.f32.mrf.mxu0 }
  0xc8   : > { %v396_v4 = vpop.f32.mrf.mxu2 }
  0xca   : > { %v419_v5 = vpop.f32.mrf.mxu3 }
  0xcd   : > { %v440_v7 = vpop.f32.mrf.mxu0 }
  0xce   : > { %v444_v8 = vadd.f32 %v440_v7, %v421_v6 }
  0xd0   : > { %446 = vst.msk [vmem:[%s212_s18] sm:$0xff] %vm445_vm2, %v444_v8 }
  0xd1   : > { %668 = shalt.err (!%p665_p7)
}
  0xd2   : > { %586 = dma.vmem_to_hbm [thread:$0]  (%p775_p5), %s462_s20, 128, %s464_s23, %s448_s12  }
  0xd5   : > { %v442_v9 = vpop.f32.mrf.mxu0 }
  0xd6 PF: > { %s475_s6 = sand.u32 1, %s699_s9   ;;  %p589_p8 = pnand %p558_p10, %p786_p9 }
  0xd7   : > { %s476_s3 = scalar_lea.sflag [#allocation4], %s475_s6 }
  0xd8   : > { %p590_p11 = pneg %p589_p8 }
  0xda   : > { %694 = dma.done.wait (%p590_p11), %s476_s3, 128  }
  0xdb   : > { %696 = vsyncadd (%p590_p11), %s476_s3, 4294967168  ;;  %s15_s14 = sadd.s32 1, %s719_s14   ;;  %s893_s9 = smov %s703_s10 }
  0xdc   : > { %p12_p12 = scmp.ge.s32.totalorder %s15_s14, 4   ;;  %s894_s10 = smov %s707_s11 }
  0xdd   : > { %s895_s11 = smov %s784_s21  ;;  %s896_s12 = smov %s715_s13 }
  0xde   : > { %s897_s13 = smov %s899_s17  ;;  %14 = sbr.rel (!%p12_p12) target bundleno = 4 (0x4), region = 118 }
  0xe3   :  { %482 = vsyncpa [#allocation4], 1 }
  0xe4   :  { %484 = vsyncpa [#allocation4 + $0x1], 1 }

// kernel: tpu_custom_call.1
= control target key start
LH: loop header
LB: loop body
LE: loop exit
PB: predicated region body
PF: predicated region fallthrough
CT: control target
= control target key end

     0   :  { %7 = vsyncpa [#allocation4], 0  ;;  %s888_s0 = inlined_call_operand.vmem [shape: f32[2,16,4], index: 0, kind: input, shape index: {}]   ;;  %s889_s1 = inlined_call_operand.vmem [shape: bf16[1,9,4,32], index: 1, kind: input, shape index: {}]   ;;  %s890_s2 = inlined_call_operand.hbm [shape: f32[16,32], index: 2, kind: output, shape index: {}]  }
   0x1   :  { %9 = vsyncpa [#allocation4 + $0x1], 0  ;;  %s736_s9 = smov 0   ;;  %s738_s10 = smov 0  }
   0x2   :  { %s740_s11 = smov 0   ;;  %s742_s12 = smov 0  }
   0x3   :  { %s744_s13 = smov 0   ;;  %s746_s14 = smov 0  }
   0x4 LB: > { %s554_s15 = sadd.s32 4294967295, %s719_s14   ;;  %s555_s16 = sadd.s32 4294967294, %s719_s14   ;;  %s719_s14 = sphi %s746_s14, %s15_s14   ;;  %s715_s13 = sphi %s744_s13, %s897_s13   ;;  %s711_s12 = sphi %s742_s12, %s896_s12   ;;  %s707_s11 = sphi %s740_s11, %s895_s11   ;;  %s703_s10 = sphi %s738_s10, %s894_s10   ;;  %s699_s9 = sphi %s736_s9, %s893_s9  }
   0x5   : > { %s24_s17 = sadd.s32 1, %s715_s13  ;;  %s36_s18 = sadd.s32 1, %s707_s11 }
   0x6   : > { %p25_p0 = scmp.ge.s32.totalorder %s24_s17, 2  ;;  %p43_p1 = scmp.ne.s32.totalorder %s707_s11, %s703_s10 }
   0x7   : > { %p44_p2 = scmp.eq.s32.totalorder %s719_s14, 0  ;;  %p101_p3 = scmp.eq.s32.totalorder %s554_s15, 1 }
   0x8   : > { %s899_s17 = smov (%p25_p0, %s24_s17), 0  ;;  %p106_p6 = scmp.ne.s32.totalorder %s703_s10, %s699_s9 }
   0x9   : > { %p45_p4 = por %p44_p2, %p43_p1  ;;  %p775_p5 = por %p101_p3, %p43_p1 }
   0xa   : > { %s31_s20 = ssub.s32 %s715_s13, %s899_s17  ;;  %p107_p8 = scmp.eq.s32.totalorder %s555_s16, 1 }
   0xb   : > { %p34_p7 = scmp.eq.s32.totalorder %s31_s20, 0  ;;  %p558_p10 = scmp.ge.s32.totalorder %s719_s14, 2 }
   0xc   : > { %p786_p9 = por %p107_p8, %p106_p6 }
   0xd   : > { %s784_s21 = scalar_select %p34_p7, %s707_s11, %s36_s18  }
   0xe   : > { %131 = sbr.rel (%p558_p10) target bundleno = 25 (0x19), region = 20 }
  0x13   : > { %134 = sbr.rel (!%p45_p4) target bundleno = 25 (0x19), region = 24  ;;  %s136_s23 = sand.u32 (%p45_p4), 1, %s707_s11  }
  0x14   : > { %s560_s24 = sshll.u32 (%p45_p4), %s715_s13, 3  ;;  %s559_s25 = sshll.u32 (%p45_p4), %s136_s23, 4 }
  0x15   : > { %s141_s28 = scalar_lea.vmem (%p45_p4), %s888_s0, %s560_s24  ;;  %s138_s29 = scalar_lea.vmem (%p45_p4), [#allocation2], %s559_s25 }
  0x16   : > { %v172_v0 = vld [vmem:[%s141_s28] sm:$0xff] (%p45_p4)  ;;  %v174_v1 = vld [vmem:[%s141_s28 + $0x10] sm:$0xff] (%p45_p4) }
  0x17   : > { %173 = vst [vmem:[%s138_s29] sm:$0xff] (%p45_p4), %v172_v0 }
  0x18   : > { %175 = vst [vmem:[%s138_s29 + $0x8] sm:$0xff] %v174_v1 }
  0x19 PF: > { %p561_p11 = scmp.ge.s32.totalorder %s719_s14, 1  ;;  %p180_p12 = scmp.lt.s32.totalorder %s719_s14, 3 }
  0x1b   : > { %p181_p13 = pnand %p561_p11, %p180_p12 }
  0x1c   : > { %s807_s6 = sand.u32 (!%p181_p13), 1, %s703_s10   ;;  %s583_s5 = sshll.u32 (!%p181_p13), %s711_s12, 3 }
  0x1d   : > { %184 = sbr.rel (%p181_p13) target bundleno = 214 (0xd6), region = 62  ;;  %s562_s18 = sshll.u32 (!%p181_p13), %s807_s6, 4 }
  0x1e   : > { %s189_s28 = scalar_lea.vmem (!%p181_p13), [#allocation2], %s562_s18  ;;  %s563_s7 = sshll.u32 (!%p181_p13), %s807_s6, 3 }
  0x1f   : > { %s459_s16 = scalar_lea.hbm (!%p181_p13), %s890_s2, %s583_s5  ;;  %s212_s18 = scalar_lea.vmem (!%p181_p13), [#allocation3], %s563_s7 }
  0x20   : > { %s461_s20 = sshll.u32 (!%p181_p13), %s212_s18, 4  ;;  %s463_s23 = sshll.u32 (!%p181_p13), %s459_s16, 4  ;;  %s462_s20 = int_to_ptr.vmem [resolvable:$true] %s461_s20  ;;  %s464_s23 = int_to_ptr.hbm [resolvable:$true] %s463_s23 }
  0x21   : > { %s448_s12 = scalar_lea.sflag (!%p181_p13), [#allocation4], %s807_s6  ;;  %s655_s24 = sshra.s32 (!%p181_p13), %s464_s23, 4  ;;  %s656_s24 = int_to_ptr.hbm [resolvable:$true] %s655_s24 }
  0x22   : > { %vm248_vm0 = vcmask 1041408   ;;  %v568_v2 = vld [vmem:[%s889_s1 + $0x4] sm:$0x3]  ;;  %v565_v3 = vld [vmem:[%s889_s1 + $0x2] sm:$0x3]  ;;  %v564_v15 = vld [vmem:[%s189_s28 + $0x8] sm:$0xff]  ;;  %p662_p3 = scmp.lt.s32.totalorder %s656_s24, %s890_s2 }
  0x23   : > { %v291_v4 = vsel %vm248_vm0, %v568_v2, 0  ;;  %v250_v5 = vsel %vm248_vm0, %v565_v3, 0  ;;  %v240_v6 = vld [vmem:[%s889_s1] sm:$0x3]  ;;  %v570_v7 = vld [vmem:[%s889_s1 + $0x6] sm:$0x3] }
  0x24   : > { %300 = vmatpush.bf16.msra.mxu2 %v291_v4  ;;  %259 = vmatpush.bf16.msra.mxu0 %v250_v5  ;;  %v269_v8 = vsel %vm248_vm0, %v240_v6, 0  ;;  %v314_v9 = vsel %vm248_vm0, %v570_v7, 0  ;;  %v572_v10 = vld [vmem:[%s889_s1 + $0x8] sm:$0x3]  ;;  %v576_v12 = vld [vmem:[%s889_s1 + $0xc] sm:$0x3] }
  0x25   : > { %278 = vmatpush.bf16.msra.mxu1 %v269_v8  ;;  %323 = vmatpush.bf16.msra.mxu3 %v314_v9  ;;  %v337_v11 = vsel %vm248_vm0, %v572_v10, 0  ;;  %v578_v13 = vld [vmem:[%s889_s1 + $0xe] sm:$0x3]  ;;  %v219_v14 = vld [vmem:[%s189_s28] sm:$0xff]  ;;  %v383_v16 = vsel %vm248_vm0, %v576_v12, 0  ;;  %v226_v20 = vmax.f32 %v564_v15, 0.0 }
  0x26   : > { %v406_v17 = vsel %vm248_vm0, %v578_v13, 0  ;;  %v574_v18 = vld [vmem:[%s889_s1 + $0xa] sm:$0x3]  ;;  %v220_v19 = vmax.f32 %v219_v14, 0.0  ;;  %vm244_vm1 = vcmask 31744   ;;  %vm445_vm2 = vcmask 261120  }
  0x27   : > { %v360_v21 = vsel %vm248_vm0, %v574_v18, 0  ;;  %v227_v23 = vsub.f32 %v226_v20, %v564_v15  ;;  %v228_v25 = vsub.f32 1.0, %v226_v20  ;;  %v580_v30 = vld [vmem:[%s889_s1 + $0x10] sm:$0x3]  ;;  %s657_s25 = scalar_lea.hbm %s656_s24, 8  ;;  %s661_s28 = scalar_lea.hbm %s890_s2, 16 }
  0x28   : > { %346 = vmatpush.bf16.msrb.mxu0 %v337_v11  ;;  %392 = vmatpush.bf16.msrb.mxu2 %v383_v16  ;;  %v221_v22 = vsub.f32 %v220_v19, %v219_v14  ;;  %v222_v24 = vsub.f32 1.0, %v220_v19  ;;  %v429_v37 = vsel %vm248_vm0, %v580_v30, 0  ;;  %v238_v46 = vmul.f32 %v226_v20, %v220_v19  ;;  %p658_p0 = scmp.ne.s32.totalorder %s656_s24, %s657_s25  ;;  %p663_p4 = scmp.lt.s32.totalorder %s661_s28, %s657_s25 }
  0x29   : > { %415 = vmatpush.bf16.msrb.mxu3 %v406_v17  ;;  %369 = vmatpush.bf16.msrb.mxu1 %v360_v21  ;;  %v232_v26 = vmul.f32 %v227_v23, %v220_v19  ;;  %v229_v29 = vsub.f32 %v228_v25, %v227_v23 }
  0x2a   : > { %v223_v27 = vsub.f32 %v222_v24, %v221_v22  ;;  %v230_v28 = vmul.f32 %v227_v23, %v221_v22  ;;  %v236_v38 = vmul.f32 %v226_v20, %v221_v22  ;;  %v422_v47 = vpack.c.bf16 %v238_v46, %v238_v46  ;;  %p659_p1 = pnand %p658_p0, %p775_p5  ;;  %p664_p6 = por %p663_p4, %p662_p3 }
  0x2b   : > { %v284_v31 = vpack.c.bf16 %v232_v26, %v232_v26  ;;  %v233_v34 = vmul.f32 %v229_v29, %v221_v22  ;;  %v235_v39 = vmul.f32 %v229_v29, %v220_v19 }
  0x2c   : > { %v231_v32 = vmul.f32 %v227_v23, %v223_v27  ;;  %v239_v33 = vpack.c.bf16 %v230_v28, %v230_v28  ;;  %v234_v40 = vmul.f32 %v229_v29, %v223_v27  ;;  %v237_v41 = vmul.f32 %v226_v20, %v223_v27  ;;  %p660_p2 = pneg %p659_p1 }
  0x2d   : > { %569 = vmatmul.msk.bf16.vlgmr.msra.gmra.mxu2 %vm244_vm1, %v284_v31  ;;  %v307_v36 = vpack.c.bf16 %v233_v34, %v233_v34  ;;  %v376_v42 = vpack.c.bf16 %v236_v38, %v236_v38  ;;  %v353_v43 = vpack.c.bf16 %v235_v39, %v235_v39 }
  0x2e   : > { %v241_v35 = vpack.c.bf16 %v231_v32, %v231_v32  ;;  %567 = vmatmul.msk.bf16.vlgmr.msra.gmra.mxu1 %vm244_vm1, %v239_v33  ;;  %v330_v44 = vpack.c.bf16 %v234_v40, %v234_v40  ;;  %v399_v45 = vpack.c.bf16 %v237_v41, %v237_v41  ;;  %p665_p7 = pnand %p664_p6, %p660_p2 }
  0x2f   : > { %571 = vmatmul.msk.bf16.vlgmr.msra.gmra.mxu3 %vm244_vm1, %v307_v36 }
  0x30   : > { %566 = vmatmul.msk.bf16.vlgmr.msra.gmra.mxu0 %vm244_vm1, %v241_v35 }
  0x31   : > { %438 = vmatpush.bf16.msra.mxu0 %v429_v37 }
  0x3d   : > { %577 = vmatmul.msk.bf16.vlgmr.msrb.gmra.mxu2 %vm244_vm1, %v376_v42 }
  0x3e   : > { %575 = vmatmul.msk.bf16.vlgmr.msrb.gmra.mxu1 %vm244_vm1, %v353_v43 }
  0x3f   : > { %579 = vmatmul.msk.bf16.vlgmr.msrb.gmra.mxu3 %vm244_vm1, %v399_v45 }
  0x40   : > { %573 = vmatmul.msk.bf16.vlgmr.msrb.gmra.mxu0 %vm244_vm1, %v330_v44 }
  0x50   : > { %581 = vmatmul.msk.bf16.vlgmr.msra.gmra.mxu0 %vm244_vm1, %v422_v47 }
  0xab   : > { %v280_v48 = vpop.f32.mrf.mxu1 }
  0xad   : > { %v261_v49 = vpop.f32.mrf.mxu0 }
  0xae   : > { %v281_v54 = vadd.f32 %v280_v48, %v261_v49 }
  0xb0   : > { %v302_v50 = vpop.f32.mrf.mxu2 }
  0xb1   : > { %v306_v56 = vadd.f32 %v302_v50, %v281_v54 }
  0xb2   : > { %v325_v51 = vpop.f32.mrf.mxu3 }
  0xb3   : > { %v282_v52 = vpop.f32.mrf.mxu1  ;;  %v329_v60 = vadd.f32 %v325_v51, %v306_v56 }
  0xb5   : > { %v263_v53 = vpop.f32.mrf.mxu0 }
  0xb8   : > { %v304_v55 = vpop.f32.mrf.mxu2 }
  0xba   : > { %v327_v57 = vpop.f32.mrf.mxu3 }
  0xbb   : > { %v371_v58 = vpop.f32.mrf.mxu1 }
  0xbd   : > { %v348_v59 = vpop.f32.mrf.mxu0 }
  0xbe   : > { %v352_v61 = vadd.f32 %v348_v59, %v329_v60 }
  0xc0   : > { %v394_v62 = vpop.f32.mrf.mxu2  ;;  %v375_v1 = vadd.f32 %v371_v58, %v352_v61 }
  0xc2   : > { %v417_v63 = vpop.f32.mrf.mxu3  ;;  %v398_v3 = vadd.f32 %v394_v62, %v375_v1 }
  0xc3   : > { %v373_v0 = vpop.f32.mrf.mxu1 }
  0xc4   : > { %v421_v6 = vadd.f32 %v417_v63, %v398_v3 }
  0xc5   : > { %v350_v2 = vpop.f32.mrf.mxu0 }
  0xc8   : > { %v396_v4 = vpop.f32.mrf.mxu2 }
  0xca   : > { %v419_v5 = vpop.f32.mrf.mxu3 }
  0xcd   : > { %v440_v7 = vpop.f32.mrf.mxu0 }
  0xce   : > { %v444_v8 = vadd.f32 %v440_v7, %v421_v6 }
  0xd0   : > { %446 = vst.msk [vmem:[%s212_s18] sm:$0xff] %vm445_vm2, %v444_v8 }
  0xd1   : > { %668 = shalt.err (!%p665_p7)
}
  0xd2   : > { %586 = dma.vmem_to_hbm [thread:$0]  (%p775_p5), %s462_s20, 128, %s464_s23, %s448_s12  }
  0xd5   : > { %v442_v9 = vpop.f32.mrf.mxu0 }
  0xd6 PF: > { %s475_s6 = sand.u32 1, %s699_s9   ;;  %p589_p8 = pnand %p558_p10, %p786_p9 }
  0xd7   : > { %s476_s3 = scalar_lea.sflag [#allocation4], %s475_s6 }
  0xd8   : > { %p590_p11 = pneg %p589_p8 }
  0xda   : > { %694 = dma.done.wait (%p590_p11), %s476_s3, 128  }
  0xdb   : > { %696 = vsyncadd (%p590_p11), %s476_s3, 4294967168  ;;  %s15_s14 = sadd.s32 1, %s719_s14   ;;  %s893_s9 = smov %s703_s10 }
  0xdc   : > { %p12_p12 = scmp.ge.s32.totalorder %s15_s14, 4   ;;  %s894_s10 = smov %s707_s11 }
  0xdd   : > { %s895_s11 = smov %s784_s21  ;;  %s896_s12 = smov %s715_s13 }
  0xde   : > { %s897_s13 = smov %s899_s17  ;;  %14 = sbr.rel (!%p12_p12) target bundleno = 4 (0x4), region = 118 }
  0xe3   :  { %482 = vsyncpa [#allocation4], 1 }
  0xe4   :  { %484 = vsyncpa [#allocation4 + $0x1], 1 }

</bundles_post_ra>
